<compile_context>
chip_gen: v6e
topology: v6e:2x2x1
jax: 0.10.0
libtpu: 0.0.40
codegen_flags: <defaults>
</compile_context>

<pallas_src>
import functools

import jax
import jax.numpy as jnp
import numpy as np
from jax import lax
from jax.experimental import pallas as pl
from jax.experimental.pallas import tpu as pltpu

_EPS = 1e-5          # torch GroupNorm default eps
_LANES = 128         # pad the folded (batch*time) axis to a lane multiple


def _num_groups(ch: int) -> int:
    g = 32
    while ch % g:
        g //= 2
    return g


def _round8(n: int) -> int:
    return -(-n // 8) * 8


def _gelu_tanh(x):
    # tanh-approx GELU (EUP path).  |err| vs exact erf GELU ~1e-3.
    c = 0.7978845608028654  # sqrt(2/pi)
    return 0.5 * x * (1.0 + jnp.tanh(c * (x + 0.044715 * x * x * x)))


def _gelu_erf(x):
    # exact (erf) GELU, used by the pure-JAX reference only
    return 0.5 * x * (1.0 + lax.erf(x * (2.0 ** -0.5)))


# --------------------------------- kernel ---------------------------------- #

def _make_resblock_kernel(*, B, T, Cin, Cout, emb, G1, G2, has_skip, dilation,
                          col_off, cond_off, mask_off, segt_off, mm_dtype):
    cpg1, cpg2 = Cin // G1, Cout // G2
    inv_t = 1.0 / float(T)
    w1_rows = 3 * Cout
    ws_off = _round8(w1_rows)

    def kernel(*refs):
        i = 0
        x_ref = refs[i]; i += 1          # (Cin, L)        f32
        aux_ref = refs[i]; i += 1        # (Ra, L)         f32: cond | masks | segT
        seg_ref = refs[i]; i += 1        # (L, B)          f32 segment indicators
        cols_ref = refs[i]; i += 1       # (Rc, 1)         f32 packed channel params
        w_in_ref = refs[i]; i += 1       # (Rw, Cin)       mm_dtype: conv1 taps | skip
        w_out_ref = refs[i]; i += 1      # (3*Cout, Cout)  mm_dtype out-conv taps
        wc_ref = refs[i]; i += 1         # (2*Cout, emb)   mm_dtype FiLM linear
        if cpg1 > 1:
            oh1_gc, oh1_cg = refs[i][...], refs[i + 1][...]; i += 2
        else:
            oh1_gc = oh1_cg = None
        if cpg2 > 1:
            oh2_gc, oh2_cg = refs[i][...], refs[i + 1][...]; i += 2
        else:
            oh2_gc = oh2_cg = None
        out_ref = refs[i]                # (Cout, L) f32

        x = x_ref[...]
        seg = seg_ref[...]                                  # (L, B)
        segt = aux_ref[segt_off:segt_off + B, :]            # (B, L)
        masks = aux_ref[mask_off:mask_off + 4, :]           # (4, L)
        cond_rows = aux_ref[cond_off:cond_off + emb, :]     # (emb, L)

        def col(name, n):
            o = col_off[name]
            return cols_ref[o:o + n, :]                     # (n, 1)

        def group_norm(v, gamma, beta, cpg, oh_gc, oh_cg):
            # per-(batch, channel) mean over time: segment-matmul reduce+bcast
            m_cb = jnp.dot(v, seg, preferred_element_type=jnp.float32) * inv_t
            if cpg > 1:     # aggregate channels within each group
                m_cb = jnp.dot(
                    oh_cg,
                    jnp.dot(oh_gc, m_cb, preferred_element_type=jnp.float32)
                    * (1.0 / cpg),
                    preferred_element_type=jnp.float32)
            ctr = v - jnp.dot(m_cb, segt, preferred_element_type=jnp.float32)
            # two-pass (centered) variance: no E[x^2]-E[x]^2 cancellation
            v_cb = jnp.dot(ctr * ctr, seg,
                           preferred_element_type=jnp.float32) * inv_t
            if cpg > 1:
                v_cb = jnp.dot(
                    oh_cg,
                    jnp.dot(oh_gc, v_cb, preferred_element_type=jnp.float32)
                    * (1.0 / cpg),
                    preferred_element_type=jnp.float32)
            inv = jnp.dot(lax.rsqrt(v_cb + _EPS), segt,
                          preferred_element_type=jnp.float32)
            return ctr * inv * gamma + beta

        def conv3(h, w_all, bias, m_left, m_right, d):
            # k=3 dilated conv: one MXU dot with stacked taps, then +/-d lane
            # rolls (XLU slot) masked at sequence / batch-run boundaries.
            y = jnp.dot(w_all, h.astype(mm_dtype),
                        preferred_element_type=jnp.float32)   # (3*Cout, L)
            lanes = y.shape[-1]
            left = pltpu.roll(y[0:Cout], shift=d, axis=1) * m_left
            right = pltpu.roll(y[2 * Cout:3 * Cout], shift=lanes - d,
                               axis=1) * m_right
            return y[Cout:2 * Cout] + left + right + bias

        # pre_cond: GroupNorm -> GELU -> Resize(identity) -> Conv(k=3, p=1)
        #           -> GroupNorm
        h = group_norm(x, col("gamma1", Cin), col("beta1", Cin),
                       cpg1, oh1_gc, oh1_cg)
        h = _gelu_tanh(h)
        h = conv3(h, w_in_ref[0:w1_rows, :], col("b1", Cout),
                  masks[0:1], masks[1:2], 1)
        h = group_norm(h, col("gamma2", Cout), col("beta2", Cout),
                       cpg2, oh2_gc, oh2_cg)

        # FiLM: cond_layers = GELU -> Linear(emb, 2*Cout) (scaled 0.1 at init).
        # cond is already repeated per time step on the lane axis, so one
        # lane-dense MXU dot yields the per-lane scale/shift directly.
        ab = jnp.dot(wc_ref[...], _gelu_tanh(cond_rows).astype(mm_dtype),
                     preferred_element_type=jnp.float32) + col("bc", 2 * Cout)
        h = h * (ab[0:Cout] + 1.0) + ab[Cout:2 * Cout]

        # post_cond: GELU -> Conv(k=3, padding=dilation, dilation)
        # (dropout == 0.0 -> the module has no dropout layer)
        h = _gelu_tanh(h)
        h = conv3(h, w_out_ref[...], col("bo", Cout),
                  masks[2:3], masks[3:4], dilation)

        # skip: Resize(identity) -> Identity / 1x1 conv
        if has_skip:
            skip = jnp.dot(w_in_ref[ws_off:ws_off + Cout, :],
                           x.astype(mm_dtype),
                           preferred_element_type=jnp.float32) + col("bs", Cout)
        else:
            skip = x
        out_ref[...] = (skip + h).astype(out_ref.dtype)

    return kernel


# ------------------------------ host wrapper ------------------------------- #

def resblock_pallas(x_nct, cond, params, *, dilation=2, mm_dtype=jnp.bfloat16):
    """ResBlock forward.  x_nct: (B, C, T); cond: (B, emb) -> (B, Cout, T)."""
    # TODO(synk): Resize with scale_factor != 1.0 (avg_pool1d / F.interpolate)
    # and training-mode dropout are not implemented; the module defaults
    # (scale_factor=1.0, dropout=0.0) are assumed.
    f32 = jnp.float32
    B, Cin, T = x_nct.shape
    Cout = params["b1"].shape[0]
    emb = cond.shape[1]
    G1, G2 = _num_groups(Cin), _num_groups(Cout)
    has_skip = (Cin != Cout)

    L = B * T
    Lp = -(-L // _LANES) * _LANES          # lane-pad the folded axis

    # ---- activations: fold batch into lanes -> (C, B*T), pad to Lp lanes ----
    x_fold = jnp.transpose(x_nct.astype(f32), (1, 0, 2)).reshape(Cin, L)
    x_fold = jnp.zeros((Cin, Lp), f32).at[:, :L].set(x_fold)

    # ---- aux slab: [cond rows | conv validity masks | segment indicators] ----
    pos = np.arange(Lp)
    t_idx = pos % T
    valid = pos < L
    masks_np = np.stack([
        (t_idx >= 1) & valid,              # conv1 left tap   (d = 1)
        (t_idx < T - 1) & valid,           # conv1 right tap
        (t_idx >= dilation) & valid,       # out-conv left tap  (d = dilation)
        (t_idx < T - dilation) & valid,    # out-conv right tap
    ]).astype(np.float32)                                       # (4, Lp)
    segt_np = ((pos[None, :] // T == np.arange(B)[:, None]) & valid[None, :]
               ).astype(np.float32)                             # (B, Lp)

    cond_rows = jnp.broadcast_to(cond.astype(f32).T[:, :, None],
                                 (emb, B, T)).reshape(emb, L)

    cond_off = 0
    mask_off = _round8(emb)
    segt_off = mask_off + 8
    aux = jnp.zeros((segt_off + _round8(B), Lp), f32)
    aux = aux.at[cond_off:cond_off + emb, :L].set(cond_rows)
    aux = aux.at[mask_off:mask_off + 4, :].set(jnp.asarray(masks_np))
    aux = aux.at[segt_off:segt_off + B, :].set(jnp.asarray(segt_np))
    seg = jnp.asarray(segt_np.T)                                # (Lp, B)

    # ---- packed per-channel column parameters (8-aligned static offsets) ----
    col_items = [("gamma1", Cin), ("beta1", Cin), ("b1", Cout),
                 ("gamma2", Cout), ("beta2", Cout), ("bc", 2 * Cout),
                 ("bo", Cout)]
    if has_skip:
        col_items.append(("bs", Cout))
    col_off, pieces, off = {}, [], 0
    for name, n in col_items:
        v = jnp.asarray(params[name], f32).reshape(n)
        pad = _round8(n) - n
        if pad:
            v = jnp.concatenate([v, jnp.zeros((pad,), f32)])
        col_off[name] = off
        pieces.append(v)
        off += _round8(n)
    cols = jnp.concatenate(pieces).reshape(off, 1)

    # ---- packed weight slabs (MXU operands, cast to mm_dtype) ----
    def taps(w):  # (Cout, C, 3) -> (3*Cout, C): taps stacked along sublanes
        w = jnp.asarray(w, f32)
        return jnp.concatenate([w[:, :, 0], w[:, :, 1], w[:, :, 2]], axis=0)

    w1_rows = 3 * Cout
    blocks = [taps(params["w1"])]                               # (3*Cout, Cin)
    pad = _round8(w1_rows) - w1_rows
    if pad:
        blocks.append(jnp.zeros((pad, Cin), f32))
    if has_skip:
        blocks.append(jnp.asarray(params["ws"], f32)[:, :, 0])  # (Cout, Cin)
    w_in = jnp.concatenate(blocks, axis=0).astype(mm_dtype)
    w_out = taps(params["wo"]).astype(mm_dtype)                 # (3*Cout, Cout)
    wc = jnp.asarray(params["wc"], f32).astype(mm_dtype)        # (2*Cout, emb)

    # ---- optional one-hot group-aggregation matrices (cpg > 1 only) ----
    extra = []
    onehot = lambda C, G: (np.arange(C)[:, None] // (C // G)
                           == np.arange(G)[None, :]).astype(np.float32)
    if Cin // G1 > 1:
        m = onehot(Cin, G1)
        extra += [jnp.asarray(m.T), jnp.asarray(m)]
    if Cout // G2 > 1:
        m = onehot(Cout, G2)
        extra += [jnp.asarray(m.T), jnp.asarray(m)]

    kernel = _make_resblock_kernel(
        B=B, T=T, Cin=Cin, Cout=Cout, emb=emb, G1=G1, G2=G2,
        has_skip=has_skip, dilation=dilation, col_off=col_off,
        cond_off=cond_off, mask_off=mask_off, segt_off=segt_off,
        mm_dtype=mm_dtype)

    # Single un-gridded pallas_call: all (tiny) operands resident in VMEM, one
    # invocation, one full-lane-width store.  NOTE(v7x): for large B,
    # reintroduce a 2-wide 'parallel' grid over lane blocks so both
    # TensorCores get work; at these shapes a single step is strictly cheaper
    # on every generation (no per-step pipeline overhead).
    out_fold = pl.pallas_call(
        kernel,
        out_shape=jax.ShapeDtypeStruct((Cout, Lp), f32),
    )(x_fold, aux, seg, cols, w_in, w_out, wc, *extra)

    return jnp.transpose(out_fold[:, :L].reshape(Cout, B, T), (1, 0, 2))


# --------------------------- pure-JAX reference ---------------------------- #

def resblock_ref(x_nct, cond, params, *, dilation=2):
    Cin = x_nct.shape[1]
    Cout = params["b1"].shape[0]
    G1, G2 = _num_groups(Cin), _num_groups(Cout)

    def gn(h, gamma, beta, G):
        B, C, T = h.shape
        hg = h.reshape(B, G, (C // G) * T)
        mean = hg.mean(-1, keepdims=True)
        var = hg.var(-1, keepdims=True)
        hn = ((hg - mean) / jnp.sqrt(var + _EPS)).reshape(B, C, T)
        return hn * gamma[None, :, None] + beta[None, :, None]

    def conv1d(h, w, b, pad, dil):
        y = lax.conv_general_dilated(h, w, window_strides=(1,),
                                     padding=[(pad, pad)], rhs_dilation=(dil,),
                                     dimension_numbers=("NCH", "OIH", "NCH"))
        return y + b[None, :, None]

    h = gn(x_nct, params["gamma1"], params["beta1"], G1)
    h = _gelu_erf(h)
    h = conv1d(h, params["w1"], params["b1"], 1, 1)
    h = gn(h, params["gamma2"], params["beta2"], G2)
    ab = _gelu_erf(cond) @ params["wc"].T + params["bc"]
    cond_a = ab[:, :Cout, None]
    cond_b = ab[:, Cout:, None]
    h = h * (cond_a + 1.0) + cond_b
    h = _gelu_erf(h)
    h = conv1d(h, params["wo"], params["bo"], dilation, dilation)
    if Cin == Cout:
        skip = x_nct
    else:
        skip = conv1d(x_nct, params["ws"], params["bs"], 0, 1)
    return skip + h


# ----------------------------- parameter init ------------------------------ #

def init_params(key, Cin, Cout, emb, out_conv_scale=0.0):
    ks = jax.random.split(key, 12)
    rnd = lambda k, shape, s=0.3: s * jax.random.normal(k, shape, jnp.float32)
    return {
        "gamma1": 1.0 + 0.1 * jax.random.normal(ks[0], (Cin,), jnp.float32),
        "beta1": 0.1 * jax.random.normal(ks[1], (Cin,), jnp.float32),
        "w1": rnd(ks[2], (Cout, Cin, 3)),
        "b1": rnd(ks[3], (Cout,), 0.1),
        "gamma2": 1.0 + 0.1 * jax.random.normal(ks[4], (Cout,), jnp.float32),
        "beta2": 0.1 * jax.random.normal(ks[5], (Cout,), jnp.float32),
        # cond_layers Linear, scale_module(s=0.1)
        "wc": 0.1 * rnd(ks[6], (2 * Cout, emb)),
        "bc": 0.1 * rnd(ks[7], (2 * Cout,), 0.1),
        # out_conv, scale_module(s=0.0) in ResBlock.__init__
        "wo": out_conv_scale * rnd(ks[8], (Cout, Cout, 3)),
        "bo": out_conv_scale * rnd(ks[9], (Cout,), 0.1),
        # skip 1x1 conv (only used when channels != out_channels)
        "ws": rnd(ks[10], (Cout, Cin, 1)),
        "bs": rnd(ks[11], (Cout,), 0.1),
    }


if __name__ == "__main__":
    B, Cin, Cout, T, EMB = 2, 4, 8, 16, 8
    key = jax.random.PRNGKey(0)
    kx, kc, kp = jax.random.split(key, 3)
    x = jax.random.normal(kx, (B, Cin, T), jnp.float32)        # NCT, like PyTorch
    cond = jax.random.normal(kc, (B, EMB), jnp.float32)

    run_bf16 = jax.jit(functools.partial(resblock_pallas, dilation=2,
                                         mm_dtype=jnp.bfloat16))
    run_f32 = jax.jit(functools.partial(resblock_pallas, dilation=2,
                                        mm_dtype=jnp.float32))

    # (a) faithful init (out_conv scaled by 0.0, per __init__) and
    # (b) non-zero out_conv so the full conditioned path is exercised.
    for s in (0.0, 0.5):
        params = init_params(kp, Cin, Cout, EMB, out_conv_scale=s)
        y = jax.block_until_ready(run_bf16(x, cond, params))
        y_ref = resblock_ref(x, cond, params, dilation=2)
        assert y.shape == (B, Cout, T)
        np.testing.assert_allclose(np.asarray(y), np.asarray(y_ref),
                                   atol=3e-2, rtol=3e-2)

    # f32 MXU operands: tighter tolerance (only tanh-GELU approx remains).
    params = init_params(kp, Cin, Cout, EMB, out_conv_scale=0.5)
    y = jax.block_until_ready(run_f32(x, cond, params))
    y_ref = resblock_ref(x, cond, params, dilation=2)
    np.testing.assert_allclose(np.asarray(y), np.asarray(y_ref),
                               atol=2e-2, rtol=2e-2)

    # identity-skip specialization (channels == out_channels)
    params_id = init_params(kp, Cout, Cout, EMB, out_conv_scale=0.5)
    x_id = jax.random.normal(kx, (B, Cout, T), jnp.float32)
    y = jax.block_until_ready(run_bf16(x_id, cond, params_id))
    y_ref = resblock_ref(x_id, cond, params_id, dilation=2)
    np.testing.assert_allclose(np.asarray(y), np.asarray(y_ref),
                               atol=3e-2, rtol=3e-2)

    print("KERNEL_OK")
</pallas_src>

<mosaic_0001>
module attributes {stable_mosaic.version = 11 : i64} {
  func.func @kernel(%arg0: memref<4x128xf32, #tpu.memory_space<vmem>>, %arg1: memref<24x128xf32, #tpu.memory_space<vmem>>, %arg2: memref<128x2xf32, #tpu.memory_space<vmem>>, %arg3: memref<72x1xf32, #tpu.memory_space<vmem>>, %arg4: memref<32x4xbf16, #tpu.memory_space<vmem>>, %arg5: memref<24x8xbf16, #tpu.memory_space<vmem>>, %arg6: memref<16x8xbf16, #tpu.memory_space<vmem>>, %arg7: memref<8x128xf32, #tpu.memory_space<vmem>>) attributes {dimension_semantics = [], scalar_prefetch = 0 : i64, scratch_operands = 0 : i64, tpu.core_type = #tpu.core_type<tc>} {
    %c0 = arith.constant 0 : index
    %c0_0 = arith.constant 0 : index
    %0 = vector.load %arg0[%c0, %c0_0] : memref<4x128xf32, #tpu.memory_space<vmem>>, vector<4x128xf32>
    %c0_1 = arith.constant 0 : index
    %c0_2 = arith.constant 0 : index
    %1 = vector.load %arg2[%c0_1, %c0_2] : memref<128x2xf32, #tpu.memory_space<vmem>>, vector<128x2xf32>
    %c16 = arith.constant 16 : index
    %c0_3 = arith.constant 0 : index
    %2 = vector.load %arg1[%c16, %c0_3] : memref<24x128xf32, #tpu.memory_space<vmem>>, vector<2x128xf32>
    %c8 = arith.constant 8 : index
    %c0_4 = arith.constant 0 : index
    %3 = vector.load %arg1[%c8, %c0_4] : memref<24x128xf32, #tpu.memory_space<vmem>>, vector<4x128xf32>
    %c0_5 = arith.constant 0 : index
    %c0_6 = arith.constant 0 : index
    %4 = vector.load %arg1[%c0_5, %c0_6] : memref<24x128xf32, #tpu.memory_space<vmem>>, vector<8x128xf32>
    %c0_7 = arith.constant 0 : index
    %c0_8 = arith.constant 0 : index
    %5 = vector.load %arg3[%c0_7, %c0_8] : memref<72x1xf32, #tpu.memory_space<vmem>>, vector<4x1xf32>
    %c8_9 = arith.constant 8 : index
    %c0_10 = arith.constant 0 : index
    %6 = vector.load %arg3[%c8_9, %c0_10] : memref<72x1xf32, #tpu.memory_space<vmem>>, vector<4x1xf32>
    %cst = arith.constant dense<0.000000e+00> : vector<4x2xf32>
    %7 = tpu.matmul %0, %1, %cst {dimension_numbers = #tpu.dot_dimension_numbers<[1], [0], [0], [1], [0, 0, 1, 1], [], []>} : vector<4x128xf32>, vector<128x2xf32>, vector<4x2xf32> -> vector<4x2xf32>
    %cst_11 = arith.constant 6.250000e-02 : f32
    %8 = vector.broadcast %cst_11 : f32 to vector<4x2xf32>
    %9 = arith.mulf %7, %8 : vector<4x2xf32>
    %cst_12 = arith.constant dense<0.000000e+00> : vector<4x128xf32>
    %10 = tpu.matmul %9, %2, %cst_12 {dimension_numbers = #tpu.dot_dimension_numbers<[1], [0], [0], [1], [0, 0, 1, 1], [], []>} : vector<4x2xf32>, vector<2x128xf32>, vector<4x128xf32> -> vector<4x128xf32>
    %11 = arith.subf %0, %10 : vector<4x128xf32>
    %12 = arith.mulf %11, %11 : vector<4x128xf32>
    %cst_13 = arith.constant dense<0.000000e+00> : vector<4x2xf32>
    %13 = tpu.matmul %12, %1, %cst_13 {dimension_numbers = #tpu.dot_dimension_numbers<[1], [0], [0], [1], [0, 0, 1, 1], [], []>} : vector<4x128xf32>, vector<128x2xf32>, vector<4x2xf32> -> vector<4x2xf32>
    %cst_14 = arith.constant 6.250000e-02 : f32
    %14 = vector.broadcast %cst_14 : f32 to vector<4x2xf32>
    %15 = arith.mulf %13, %14 : vector<4x2xf32>
    %cst_15 = arith.constant 9.99999974E-6 : f32
    %16 = vector.broadcast %cst_15 : f32 to vector<4x2xf32>
    %17 = arith.addf %15, %16 : vector<4x2xf32>
    %18 = math.rsqrt %17 : vector<4x2xf32>
    %cst_16 = arith.constant dense<0.000000e+00> : vector<4x128xf32>
    %19 = tpu.matmul %18, %2, %cst_16 {dimension_numbers = #tpu.dot_dimension_numbers<[1], [0], [0], [1], [0, 0, 1, 1], [], []>} : vector<4x2xf32>, vector<2x128xf32>, vector<4x128xf32> -> vector<4x128xf32>
    %20 = arith.mulf %11, %19 : vector<4x128xf32>
    %21 = vector.broadcast %5 : vector<4x1xf32> to vector<4x128xf32>
    %22 = arith.mulf %20, %21 : vector<4x128xf32>
    %23 = vector.broadcast %6 : vector<4x1xf32> to vector<4x128xf32>
    %24 = arith.addf %22, %23 : vector<4x128xf32>
    %cst_17 = arith.constant 5.000000e-01 : f32
    %25 = vector.broadcast %cst_17 : f32 to vector<4x128xf32>
    %26 = arith.mulf %25, %24 : vector<4x128xf32>
    %cst_18 = arith.constant 4.471500e-02 : f32
    %27 = vector.broadcast %cst_18 : f32 to vector<4x128xf32>
    %28 = arith.mulf %27, %24 : vector<4x128xf32>
    %29 = arith.mulf %28, %24 : vector<4x128xf32>
    %30 = arith.mulf %29, %24 : vector<4x128xf32>
    %31 = arith.addf %24, %30 : vector<4x128xf32>
    %cst_19 = arith.constant 0.797884583 : f32
    %32 = vector.broadcast %cst_19 : f32 to vector<4x128xf32>
    %33 = arith.mulf %32, %31 : vector<4x128xf32>
    %34 = math.tanh %33 : vector<4x128xf32>
    %cst_20 = arith.constant 1.000000e+00 : f32
    %35 = vector.broadcast %cst_20 : f32 to vector<4x128xf32>
    %36 = arith.addf %35, %34 : vector<4x128xf32>
    %37 = arith.mulf %26, %36 : vector<4x128xf32>
    %c0_21 = arith.constant 0 : index
    %c0_22 = arith.constant 0 : index
    %38 = vector.load %arg4[%c0_21, %c0_22] : memref<32x4xbf16, #tpu.memory_space<vmem>>, vector<24x4xbf16>
    %c16_23 = arith.constant 16 : index
    %c0_24 = arith.constant 0 : index
    %39 = vector.load %arg3[%c16_23, %c0_24] : memref<72x1xf32, #tpu.memory_space<vmem>>, vector<8x1xf32>
    %40 = vector.extract_strided_slice %3 {offsets = [0, 0], sizes = [1, 128], strides = [1, 1]} : vector<4x128xf32> to vector<1x128xf32>
    %41 = vector.extract_strided_slice %3 {offsets = [1, 0], sizes = [1, 128], strides = [1, 1]} : vector<4x128xf32> to vector<1x128xf32>
    %42 = arith.truncf %37 : vector<4x128xf32> to vector<4x128xbf16>
    %cst_25 = arith.constant dense<0.000000e+00> : vector<24x128xf32>
    %43 = tpu.matmul %38, %42, %cst_25 {dimension_numbers = #tpu.dot_dimension_numbers<[1], [0], [0], [1], [0, 0, 1, 1], [], []>} : vector<24x4xbf16>, vector<4x128xbf16>, vector<24x128xf32> -> vector<24x128xf32>
    %44 = vector.extract_strided_slice %43 {offsets = [0, 0], sizes = [8, 128], strides = [1, 1]} : vector<24x128xf32> to vector<8x128xf32>
    %c1_i32 = arith.constant 1 : i32
    %45 = tpu.dynamic_rotate %44 by %c1_i32 dim 1 : vector<8x128xf32>, i32 -> vector<8x128xf32>
    %46 = vector.broadcast %40 : vector<1x128xf32> to vector<8x128xf32>
    %47 = arith.mulf %45, %46 : vector<8x128xf32>
    %48 = vector.extract_strided_slice %43 {offsets = [16, 0], sizes = [8, 128], strides = [1, 1]} : vector<24x128xf32> to vector<8x128xf32>
    %c127_i32 = arith.constant 127 : i32
    %49 = tpu.dynamic_rotate %48 by %c127_i32 dim 1 : vector<8x128xf32>, i32 -> vector<8x128xf32>
    %50 = vector.broadcast %41 : vector<1x128xf32> to vector<8x128xf32>
    %51 = arith.mulf %49, %50 : vector<8x128xf32>
    %52 = vector.extract_strided_slice %43 {offsets = [8, 0], sizes = [8, 128], strides = [1, 1]} : vector<24x128xf32> to vector<8x128xf32>
    %53 = arith.addf %52, %47 : vector<8x128xf32>
    %54 = arith.addf %53, %51 : vector<8x128xf32>
    %55 = vector.broadcast %39 : vector<8x1xf32> to vector<8x128xf32>
    %56 = arith.addf %54, %55 : vector<8x128xf32>
    %c24 = arith.constant 24 : index
    %c0_26 = arith.constant 0 : index
    %57 = vector.load %arg3[%c24, %c0_26] : memref<72x1xf32, #tpu.memory_space<vmem>>, vector<8x1xf32>
    %c32 = arith.constant 32 : index
    %c0_27 = arith.constant 0 : index
    %58 = vector.load %arg3[%c32, %c0_27] : memref<72x1xf32, #tpu.memory_space<vmem>>, vector<8x1xf32>
    %cst_28 = arith.constant dense<0.000000e+00> : vector<8x2xf32>
    %59 = tpu.matmul %56, %1, %cst_28 {dimension_numbers = #tpu.dot_dimension_numbers<[1], [0], [0], [1], [0, 0, 1, 1], [], []>} : vector<8x128xf32>, vector<128x2xf32>, vector<8x2xf32> -> vector<8x2xf32>
    %cst_29 = arith.constant 6.250000e-02 : f32
    %60 = vector.broadcast %cst_29 : f32 to vector<8x2xf32>
    %61 = arith.mulf %59, %60 : vector<8x2xf32>
    %cst_30 = arith.constant dense<0.000000e+00> : vector<8x128xf32>
    %62 = tpu.matmul %61, %2, %cst_30 {dimension_numbers = #tpu.dot_dimension_numbers<[1], [0], [0], [1], [0, 0, 1, 1], [], []>} : vector<8x2xf32>, vector<2x128xf32>, vector<8x128xf32> -> vector<8x128xf32>
    %63 = arith.subf %56, %62 : vector<8x128xf32>
    %64 = arith.mulf %63, %63 : vector<8x128xf32>
    %cst_31 = arith.constant dense<0.000000e+00> : vector<8x2xf32>
    %65 = tpu.matmul %64, %1, %cst_31 {dimension_numbers = #tpu.dot_dimension_numbers<[1], [0], [0], [1], [0, 0, 1, 1], [], []>} : vector<8x128xf32>, vector<128x2xf32>, vector<8x2xf32> -> vector<8x2xf32>
    %cst_32 = arith.constant 6.250000e-02 : f32
    %66 = vector.broadcast %cst_32 : f32 to vector<8x2xf32>
    %67 = arith.mulf %65, %66 : vector<8x2xf32>
    %cst_33 = arith.constant 9.99999974E-6 : f32
    %68 = vector.broadcast %cst_33 : f32 to vector<8x2xf32>
    %69 = arith.addf %67, %68 : vector<8x2xf32>
    %70 = math.rsqrt %69 : vector<8x2xf32>
    %cst_34 = arith.constant dense<0.000000e+00> : vector<8x128xf32>
    %71 = tpu.matmul %70, %2, %cst_34 {dimension_numbers = #tpu.dot_dimension_numbers<[1], [0], [0], [1], [0, 0, 1, 1], [], []>} : vector<8x2xf32>, vector<2x128xf32>, vector<8x128xf32> -> vector<8x128xf32>
    %72 = arith.mulf %63, %71 : vector<8x128xf32>
    %73 = vector.broadcast %57 : vector<8x1xf32> to vector<8x128xf32>
    %74 = arith.mulf %72, %73 : vector<8x128xf32>
    %75 = vector.broadcast %58 : vector<8x1xf32> to vector<8x128xf32>
    %76 = arith.addf %74, %75 : vector<8x128xf32>
    %c0_35 = arith.constant 0 : index
    %c0_36 = arith.constant 0 : index
    %77 = vector.load %arg6[%c0_35, %c0_36] : memref<16x8xbf16, #tpu.memory_space<vmem>>, vector<16x8xbf16>
    %cst_37 = arith.constant 5.000000e-01 : f32
    %78 = vector.broadcast %cst_37 : f32 to vector<8x128xf32>
    %79 = arith.mulf %78, %4 : vector<8x128xf32>
    %cst_38 = arith.constant 4.471500e-02 : f32
    %80 = vector.broadcast %cst_38 : f32 to vector<8x128xf32>
    %81 = arith.mulf %80, %4 : vector<8x128xf32>
    %82 = arith.mulf %81, %4 : vector<8x128xf32>
    %83 = arith.mulf %82, %4 : vector<8x128xf32>
    %84 = arith.addf %4, %83 : vector<8x128xf32>
    %cst_39 = arith.constant 0.797884583 : f32
    %85 = vector.broadcast %cst_39 : f32 to vector<8x128xf32>
    %86 = arith.mulf %85, %84 : vector<8x128xf32>
    %87 = math.tanh %86 : vector<8x128xf32>
    %cst_40 = arith.constant 1.000000e+00 : f32
    %88 = vector.broadcast %cst_40 : f32 to vector<8x128xf32>
    %89 = arith.addf %88, %87 : vector<8x128xf32>
    %90 = arith.mulf %79, %89 : vector<8x128xf32>
    %91 = arith.truncf %90 : vector<8x128xf32> to vector<8x128xbf16>
    %cst_41 = arith.constant dense<0.000000e+00> : vector<16x128xf32>
    %92 = tpu.matmul %77, %91, %cst_41 {dimension_numbers = #tpu.dot_dimension_numbers<[1], [0], [0], [1], [0, 0, 1, 1], [], []>} : vector<16x8xbf16>, vector<8x128xbf16>, vector<16x128xf32> -> vector<16x128xf32>
    %c40 = arith.constant 40 : index
    %c0_42 = arith.constant 0 : index
    %93 = vector.load %arg3[%c40, %c0_42] : memref<72x1xf32, #tpu.memory_space<vmem>>, vector<16x1xf32>
    %94 = vector.broadcast %93 : vector<16x1xf32> to vector<16x128xf32>
    %95 = arith.addf %92, %94 : vector<16x128xf32>
    %96 = vector.extract_strided_slice %95 {offsets = [0, 0], sizes = [8, 128], strides = [1, 1]} : vector<16x128xf32> to vector<8x128xf32>
    %cst_43 = arith.constant 1.000000e+00 : f32
    %97 = vector.broadcast %cst_43 : f32 to vector<8x128xf32>
    %98 = arith.addf %96, %97 : vector<8x128xf32>
    %99 = arith.mulf %76, %98 : vector<8x128xf32>
    %100 = vector.extract_strided_slice %95 {offsets = [8, 0], sizes = [8, 128], strides = [1, 1]} : vector<16x128xf32> to vector<8x128xf32>
    %101 = arith.addf %99, %100 : vector<8x128xf32>
    %cst_44 = arith.constant 5.000000e-01 : f32
    %102 = vector.broadcast %cst_44 : f32 to vector<8x128xf32>
    %103 = arith.mulf %102, %101 : vector<8x128xf32>
    %cst_45 = arith.constant 4.471500e-02 : f32
    %104 = vector.broadcast %cst_45 : f32 to vector<8x128xf32>
    %105 = arith.mulf %104, %101 : vector<8x128xf32>
    %106 = arith.mulf %105, %101 : vector<8x128xf32>
    %107 = arith.mulf %106, %101 : vector<8x128xf32>
    %108 = arith.addf %101, %107 : vector<8x128xf32>
    %cst_46 = arith.constant 0.797884583 : f32
    %109 = vector.broadcast %cst_46 : f32 to vector<8x128xf32>
    %110 = arith.mulf %109, %108 : vector<8x128xf32>
    %111 = math.tanh %110 : vector<8x128xf32>
    %cst_47 = arith.constant 1.000000e+00 : f32
    %112 = vector.broadcast %cst_47 : f32 to vector<8x128xf32>
    %113 = arith.addf %112, %111 : vector<8x128xf32>
    %114 = arith.mulf %103, %113 : vector<8x128xf32>
    %c0_48 = arith.constant 0 : index
    %c0_49 = arith.constant 0 : index
    %115 = vector.load %arg5[%c0_48, %c0_49] : memref<24x8xbf16, #tpu.memory_space<vmem>>, vector<24x8xbf16>
    %c56 = arith.constant 56 : index
    %c0_50 = arith.constant 0 : index
    %116 = vector.load %arg3[%c56, %c0_50] : memref<72x1xf32, #tpu.memory_space<vmem>>, vector<8x1xf32>
    %117 = vector.extract_strided_slice %3 {offsets = [2, 0], sizes = [1, 128], strides = [1, 1]} : vector<4x128xf32> to vector<1x128xf32>
    %118 = vector.extract_strided_slice %3 {offsets = [3, 0], sizes = [1, 128], strides = [1, 1]} : vector<4x128xf32> to vector<1x128xf32>
    %119 = arith.truncf %114 : vector<8x128xf32> to vector<8x128xbf16>
    %cst_51 = arith.constant dense<0.000000e+00> : vector<24x128xf32>
    %120 = tpu.matmul %115, %119, %cst_51 {dimension_numbers = #tpu.dot_dimension_numbers<[1], [0], [0], [1], [0, 0, 1, 1], [], []>} : vector<24x8xbf16>, vector<8x128xbf16>, vector<24x128xf32> -> vector<24x128xf32>
    %121 = vector.extract_strided_slice %120 {offsets = [0, 0], sizes = [8, 128], strides = [1, 1]} : vector<24x128xf32> to vector<8x128xf32>
    %c2_i32 = arith.constant 2 : i32
    %122 = tpu.dynamic_rotate %121 by %c2_i32 dim 1 : vector<8x128xf32>, i32 -> vector<8x128xf32>
    %123 = vector.broadcast %117 : vector<1x128xf32> to vector<8x128xf32>
    %124 = arith.mulf %122, %123 : vector<8x128xf32>
    %125 = vector.extract_strided_slice %120 {offsets = [16, 0], sizes = [8, 128], strides = [1, 1]} : vector<24x128xf32> to vector<8x128xf32>
    %c126_i32 = arith.constant 126 : i32
    %126 = tpu.dynamic_rotate %125 by %c126_i32 dim 1 : vector<8x128xf32>, i32 -> vector<8x128xf32>
    %127 = vector.broadcast %118 : vector<1x128xf32> to vector<8x128xf32>
    %128 = arith.mulf %126, %127 : vector<8x128xf32>
    %129 = vector.extract_strided_slice %120 {offsets = [8, 0], sizes = [8, 128], strides = [1, 1]} : vector<24x128xf32> to vector<8x128xf32>
    %130 = arith.addf %129, %124 : vector<8x128xf32>
    %131 = arith.addf %130, %128 : vector<8x128xf32>
    %132 = vector.broadcast %116 : vector<8x1xf32> to vector<8x128xf32>
    %133 = arith.addf %131, %132 : vector<8x128xf32>
    %c24_52 = arith.constant 24 : index
    %c0_53 = arith.constant 0 : index
    %134 = vector.load %arg4[%c24_52, %c0_53] : memref<32x4xbf16, #tpu.memory_space<vmem>>, vector<8x4xbf16>
    %135 = arith.truncf %0 : vector<4x128xf32> to vector<4x128xbf16>
    %cst_54 = arith.constant dense<0.000000e+00> : vector<8x128xf32>
    %136 = tpu.matmul %134, %135, %cst_54 {dimension_numbers = #tpu.dot_dimension_numbers<[1], [0], [0], [1], [0, 0, 1, 1], [], []>} : vector<8x4xbf16>, vector<4x128xbf16>, vector<8x128xf32> -> vector<8x128xf32>
    %c64 = arith.constant 64 : index
    %c0_55 = arith.constant 0 : index
    %137 = vector.load %arg3[%c64, %c0_55] : memref<72x1xf32, #tpu.memory_space<vmem>>, vector<8x1xf32>
    %138 = vector.broadcast %137 : vector<8x1xf32> to vector<8x128xf32>
    %139 = arith.addf %136, %138 : vector<8x128xf32>
    %140 = arith.addf %139, %133 : vector<8x128xf32>
    %c0_56 = arith.constant 0 : index
    %c0_57 = arith.constant 0 : index
    %141 = vector.load %arg7[%c0_56, %c0_57] : memref<8x128xf32, #tpu.memory_space<vmem>>, vector<8x128xf32>
    tpu.vector_store %arg7[%c0_56, %c0_57], %140 {strides = array<i32>} : memref<8x128xf32, #tpu.memory_space<vmem>>, vector<8x128xf32>,
    return
  }
}

</mosaic_0001>

<bundles_post_ra>
// kernel: resblock_pallas.1
= control target key start
LH: loop header
LB: loop body
LE: loop exit
PB: predicated region body
PF: predicated region fallthrough
CT: control target
= control target key end

     0   :  { %v1325_v0 = vmov 0.0   ;;  %vm1326_vm0 = vmmov 0   ;;  %vm124_vm1 = vcmask 1041408   ;;  %vm120_vm2 = vcmask 15360   ;;  %s1328_s20 = smov 127   ;;  %s1329_s23 = smov 1   ;;  %s1710_s2 = inlined_call_operand.vmem [shape: f32[128,2], index: 2, kind: input, shape index: {}]   ;;  %s1711_s0 = inlined_call_operand.vmem [shape: f32[4,128], index: 0, kind: input, shape index: {}]   ;;  %s1712_s1 = inlined_call_operand.vmem [shape: f32[24,128], index: 1, kind: input, shape index: {}]   ;;  %s1713_s3 = inlined_call_operand.vmem [shape: f32[72,1], index: 3, kind: input, shape index: {}]   ;;  %s1714_s4 = inlined_call_operand.vmem [shape: bf16[32,4], index: 4, kind: input, shape index: {}]   ;;  %s1715_s6 = inlined_call_operand.vmem [shape: bf16[16,8], index: 6, kind: input, shape index: {}]   ;;  %s1716_s5 = inlined_call_operand.vmem [shape: bf16[24,8], index: 5, kind: input, shape index: {}]   ;;  %s1717_s7 = inlined_call_operand.vmem [shape: f32[8,128], index: 7, kind: output, shape index: {}]  }
   0x1   :  { %1115 = vmatprep.subr.mxu0 %v1325_v0  ;;  %v1376_v1 = vld [vmem:[%s1710_s2 + $0x78] sm:$0xff]  ;;  %v1381_v2 = vld [vmem:[%s1710_s2 + $0x70] sm:$0xff]  ;;  %1147 = vmatprep.mubr.msk.f32.mxu0 %vm1326_vm0, %v1325_v0  ;;  %v1391_v3 = vld [vmem:[%s1710_s2 + $0x68] sm:$0xff]  ;;  %v1327_v26 = vmov 0   ;;  %vm381_vm3 = vcmask 31744   ;;  %v441_v63 = vlaneseq  ;;  %vm801_vm4 = vcmask 1043456  }
   0x2   :  { %1116 = vmatpush3.msra.mxu0 %v1376_v1  ;;  %1150 = vmatprep.subr.mxu1 %v1325_v0  ;;  %v1400_v4 = vld [vmem:[%s1710_s2 + $0x60] sm:$0xff]  ;;  %v1407_v5 = vld [vmem:[%s1710_s2 + $0x58] sm:$0xff]  ;;  %v1414_v6 = vld [vmem:[%s1710_s2 + $0x50] sm:$0xff]  ;;  %vm797_vm5 = vcmask 64512   ;;  %s1330_s18 = smov 126   ;;  %s1331_s19 = smov 2  }
   0x3   :  { %1117 = vmatprep.subr.mxu0 %v1325_v0  ;;  %1152 = vmatprep.mubr.msk.f32.mxu1 %vm1326_vm0, %v1325_v0  ;;  %v1421_v7 = vld [vmem:[%s1710_s2 + $0x48] sm:$0xff]  ;;  %v1428_v8 = vld [vmem:[%s1710_s2 + $0x40] sm:$0xff]  ;;  %v1435_v9 = vld [vmem:[%s1710_s2 + $0x38] sm:$0xff] }
   0x4   :  { %1118 = vmatpush3.msra.mxu0 %v1381_v2  ;;  %v1442_v10 = vld [vmem:[%s1710_s2 + $0x30] sm:$0xff]  ;;  %v1449_v11 = vld [vmem:[%s1710_s2 + $0x28] sm:$0xff]  ;;  %v1456_v12 = vld [vmem:[%s1710_s2 + $0x20] sm:$0xff]  ;;  %1308 = vset.pattern.permute.xlu0 %v1327_v26 }
   0x5   :  { %1119 = vmatprep.subr.mxu0 %v1325_v0  ;;  %v1463_v13 = vld [vmem:[%s1710_s2 + $0x18] sm:$0xff]  ;;  %v1470_v14 = vld [vmem:[%s1710_s2 + $0x10] sm:$0xff]  ;;  %v1477_v15 = vld [vmem:[%s1710_s2 + $0x8] sm:$0xff]  ;;  %1309 = vset.pattern.permute.xlu1 %v1327_v26 }
   0x6   :  { %1120 = vmatpush3.msra.mxu0 %v1391_v3  ;;  %v1484_v16 = vld [vmem:[%s1710_s2] sm:$0xff]  ;;  %v1501_v18 = vld [vmem:[%s1712_s1 + $0x10] sm:$0x3]  ;;  %v48_v28 = vld [vmem:[%s1713_s3 + $0x8] sm:$0xf] }
   0x7   :  { %1121 = vmatprep.subr.mxu0 %v1325_v0  ;;  %v1490_v17 = vld [vmem:[%s1711_s0] sm:$0xf]  ;;  %1151 = vmatpush3.msk.msra.mxu1 %vm124_vm1, %v1501_v18  ;;  %v1311_v53 = vld [vmem:[%s1714_s4 + $0x8] ss:$0 sps:$4 sm:$0xff]   ;;  %v371_v58 = vld [vmem:[%s1713_s3 + $0x10] sm:$0xff] }
   0x8   :  { %1122 = vmatpush3.msra.mxu0 %v1400_v4  ;;  %1155 = vmatprep.subr.mxu1 %v1325_v0  ;;  %v47_v27 = vld [vmem:[%s1713_s3] sm:$0xf]  ;;  %v780_v56 = vld [vmem:[%s1713_s3 + $0x28] sm:$0xff]  ;;  %v781_v59 = vld [vmem:[%s1713_s3 + $0x30] sm:$0xff] }
   0x9   :  { %1123 = vmatprep.subr.mxu0 %v1325_v0  ;;  %349 = vperm.xlu0 %1308, %v47_v27   ;;  %v1310_v34 = vld [vmem:[%s1714_s4] sm:$0xff]   ;;  %v461_v60 = vld [vmem:[%s1713_s3 + $0x18] sm:$0xff] }
   0xa   :  { %1124 = vmatpush3.msra.mxu0 %v1407_v5  ;;  %v861_v61 = vld [vmem:[%s1713_s3 + $0x38] sm:$0xff]  ;;  %v462_v62 = vld [vmem:[%s1713_s3 + $0x20] sm:$0xff] }
   0xb   :  { %1125 = vmatprep.subr.mxu0 %v1325_v0 }
   0xc   :  { %1126 = vmatpush3.msra.mxu0 %v1414_v6 }
   0xd   :  { %1127 = vmatprep.subr.mxu0 %v1325_v0  ;;  %355 = vperm.xlu0 %1308, %v48_v28  }
   0xe   :  { %1128 = vmatpush3.msra.mxu0 %v1421_v7 }
   0xf   :  { %1129 = vmatprep.subr.mxu0 %v1325_v0 }
  0x10   :  { %1130 = vmatpush3.msra.mxu0 %v1428_v8 }
  0x11   :  { %1131 = vmatprep.subr.mxu0 %v1325_v0 }
  0x12   :  { %1132 = vmatpush3.msra.mxu0 %v1435_v9 }
  0x13   :  { %1133 = vmatprep.subr.mxu0 %v1325_v0 }
  0x14   :  { %1134 = vmatpush3.msra.mxu0 %v1442_v10 }
  0x15   :  { %1135 = vmatprep.subr.mxu0 %v1325_v0 }
  0x16   :  { %1136 = vmatpush3.msra.mxu0 %v1449_v11 }
  0x17   :  { %1137 = vmatprep.subr.mxu0 %v1325_v0 }
  0x18   :  { %1138 = vmatpush3.msra.mxu0 %v1456_v12 }
  0x19   :  { %1139 = vmatprep.subr.mxu0 %v1325_v0 }
  0x1a   :  { %1140 = vmatpush3.msra.mxu0 %v1463_v13 }
  0x1b   :  { %1141 = vmatprep.subr.mxu0 %v1325_v0 }
  0x1c   :  { %1142 = vmatpush3.msra.mxu0 %v1470_v14 }
  0x1d   :  { %1143 = vmatprep.subr.mxu0 %v1325_v0 }
  0x1e   :  { %1144 = vmatpush3.msra.mxu0 %v1477_v15 }
  0x1f   :  { %1145 = vmatprep.subr.mxu0 %v1325_v0 }
  0x20   :  { %1146 = vmatpush3.msra.mxu0 %v1484_v16 }
  0x21   :  { %1148 = vmatmul.mubr.f32.vlgmr.msra.gmra.mxu0 %v1490_v17  ;;  %1190 = vmatprep.subr.mxu0 %v1325_v0 }
  0x22   :  { %1192 = vmatprep.mubr.msk.f32.mxu0 %vm1326_vm0, %v1325_v0  ;;  %1191 = vmatpush3.msk.msra.mxu0 %vm124_vm1, %v1501_v18 }
  0x23   :  { %1201 = vmatprep.subr.mxu0 %v1325_v0 }
  0x84   :  { %v350_v35 = vpop.permute.xlu0 %349 }
  0x88   :  { %v356_v40 = vpop.permute.xlu0 %355 }
  0xe1   :  { %v115_v19 = vpop.f32.mrf.mxu0 }
  0xe2   :  { %v119_v20 = vmul.f32 0.0625, %v115_v19  ;;  %v1619_v19 = vshrl.u32 %v441_v63, 7 }
  0xe3   :  { %v1149_v21 = vpop.f32.mrf.mxu0 }
  0xe4   :  { %1153 = vmatmul.mubr.msk.f32.vlgmr.msra.gmra.mxu1 %vm120_vm2, %v119_v20  ;;  %v443_v20 = vsub.s32 0, %v1619_v19  ;;  %v1625_v21 = vld [vmem:[%s1712_s1 + $0x8] sm:$0xf] }
  0xe5   :  { %1156 = vmatpush3.msra.mxu1 %v1376_v1  ;;  %1187 = vmatprep.mubr.msk.f32.mxu1 %vm1326_vm0, %v1325_v0 }
  0xe6   :  { %1157 = vmatprep.subr.mxu1 %v1325_v0 }
  0xe7   :  { %1158 = vmatpush3.msra.mxu1 %v1381_v2 }
  0xe8   :  { %1159 = vmatprep.subr.mxu1 %v1325_v0 }
  0xe9   :  { %1160 = vmatpush3.msra.mxu1 %v1391_v3 }
  0xea   :  { %1161 = vmatprep.subr.mxu1 %v1325_v0 }
  0xeb   :  { %1162 = vmatpush3.msra.mxu1 %v1400_v4 }
  0xec   :  { %1163 = vmatprep.subr.mxu1 %v1325_v0 }
  0xed   :  { %1164 = vmatpush3.msra.mxu1 %v1407_v5 }
  0xee   :  { %1165 = vmatprep.subr.mxu1 %v1325_v0 }
  0xef   :  { %1166 = vmatpush3.msra.mxu1 %v1414_v6 }
  0xf0   :  { %1167 = vmatprep.subr.mxu1 %v1325_v0 }
  0xf1   :  { %1168 = vmatpush3.msra.mxu1 %v1421_v7 }
  0xf2   :  { %1169 = vmatprep.subr.mxu1 %v1325_v0 }
  0xf3   :  { %1170 = vmatpush3.msra.mxu1 %v1428_v8 }
  0xf4   :  { %1171 = vmatprep.subr.mxu1 %v1325_v0 }
  0xf5   :  { %1172 = vmatpush3.msra.mxu1 %v1435_v9 }
  0xf6   :  { %1173 = vmatprep.subr.mxu1 %v1325_v0 }
  0xf7   :  { %1174 = vmatpush3.msra.mxu1 %v1442_v10 }
  0xf8   :  { %1175 = vmatprep.subr.mxu1 %v1325_v0 }
  0xf9   :  { %1176 = vmatpush3.msra.mxu1 %v1449_v11 }
  0xfa   :  { %1177 = vmatprep.subr.mxu1 %v1325_v0 }
  0xfb   :  { %1178 = vmatpush3.msra.mxu1 %v1456_v12 }
  0xfc   :  { %1179 = vmatprep.subr.mxu1 %v1325_v0 }
  0xfd   :  { %1180 = vmatpush3.msra.mxu1 %v1463_v13 }
  0xfe   :  { %1181 = vmatprep.subr.mxu1 %v1325_v0 }
  0xff   :  { %1182 = vmatpush3.msra.mxu1 %v1470_v14 }
 0x100   :  { %1183 = vmatprep.subr.mxu1 %v1325_v0 }
 0x101   :  { %1184 = vmatpush3.msra.mxu1 %v1477_v15 }
 0x102   :  { %1185 = vmatprep.subr.mxu1 %v1325_v0 }
 0x103   :  { %1186 = vmatpush3.msra.mxu1 %v1484_v16 }
 0x1a4   :  { %v194_v22 = vpop.f32.mrf.mxu1 }
 0x1a5   :  { %v198_v23 = vsub.f32 %v1490_v17, %v194_v22  ;;  %v444_v22 = vrot.slane %v1625_v21, %v443_v20 }
 0x1a6   :  { %v1154_v24 = vpop.f32.mrf.mxu1 }
 0x1a7   :  { %v199_v25 = vmul.f32 %v198_v23, %v198_v23  ;;  %v450_v24 = vsub.s32 1, %v1619_v19 }
 0x1a9   :  { %1188 = vmatmul.mubr.f32.vlgmr.msra.gmra.mxu1 %v199_v25  ;;  %v451_v26 = vrot.slane %v1625_v21, %v450_v24 }
 0x1aa   :  { %1197 = vmatprep.mubr.msk.bf16.mxu1 %vm381_vm3, %v1310_v34 }
 0x269   :  { %v266_v29 = vpop.f32.mrf.mxu1 }
 0x26a   :  { %v270_v30 = vmul.f32 0.0625, %v266_v29 }
 0x26b   :  { %v1189_v31 = vpop.f32.mrf.mxu1 }
 0x26c   :  { %v271_v32 = vadd.f32 1e-05, %v270_v30 }
 0x26e   :  { %1315 = vrsqrt.f32 %v271_v32 }
 0x27b   :  { %v1316_v33 = vpop.eup %1315 }
 0x27c   :  { %1193 = vmatmul.mubr.msk.f32.vlgmr.msra.gmra.mxu0 %vm120_vm2, %v1316_v33 }
 0x27d   :  { %1202 = vmatpush3.msra.mxu0 %v1376_v1  ;;  %1233 = vmatprep.mubr.msk.f32.mxu0 %vm1326_vm0, %v1325_v0 }
 0x27e   :  { %1203 = vmatprep.subr.mxu0 %v1325_v0 }
 0x27f   :  { %1204 = vmatpush3.msra.mxu0 %v1381_v2 }
 0x280   :  { %1205 = vmatprep.subr.mxu0 %v1325_v0 }
 0x281   :  { %1206 = vmatpush3.msra.mxu0 %v1391_v3 }
 0x282   :  { %1207 = vmatprep.subr.mxu0 %v1325_v0 }
 0x283   :  { %1208 = vmatpush3.msra.mxu0 %v1400_v4 }
 0x284   :  { %1209 = vmatprep.subr.mxu0 %v1325_v0 }
 0x285   :  { %1210 = vmatpush3.msra.mxu0 %v1407_v5 }
 0x286   :  { %1211 = vmatprep.subr.mxu0 %v1325_v0 }
 0x287   :  { %1212 = vmatpush3.msra.mxu0 %v1414_v6 }
 0x288   :  { %1213 = vmatprep.subr.mxu0 %v1325_v0 }
 0x289   :  { %1214 = vmatpush3.msra.mxu0 %v1421_v7 }
 0x28a   :  { %1215 = vmatprep.subr.mxu0 %v1325_v0 }
 0x28b   :  { %1216 = vmatpush3.msra.mxu0 %v1428_v8 }
 0x28c   :  { %1217 = vmatprep.subr.mxu0 %v1325_v0 }
 0x28d   :  { %1218 = vmatpush3.msra.mxu0 %v1435_v9 }
 0x28e   :  { %1219 = vmatprep.subr.mxu0 %v1325_v0 }
 0x28f   :  { %1220 = vmatpush3.msra.mxu0 %v1442_v10 }
 0x290   :  { %1221 = vmatprep.subr.mxu0 %v1325_v0 }
 0x291   :  { %1222 = vmatpush3.msra.mxu0 %v1449_v11 }
 0x292   :  { %1223 = vmatprep.subr.mxu0 %v1325_v0 }
 0x293   :  { %1224 = vmatpush3.msra.mxu0 %v1456_v12 }
 0x294   :  { %1225 = vmatprep.subr.mxu0 %v1325_v0 }
 0x295   :  { %1226 = vmatpush3.msra.mxu0 %v1463_v13 }
 0x296   :  { %1227 = vmatprep.subr.mxu0 %v1325_v0 }
 0x297   :  { %1228 = vmatpush3.msra.mxu0 %v1470_v14 }
 0x298   :  { %1229 = vmatprep.subr.mxu0 %v1325_v0 }
 0x299   :  { %1230 = vmatpush3.msra.mxu0 %v1477_v15 }
 0x29a   :  { %1231 = vmatprep.subr.mxu0 %v1325_v0 }
 0x29b   :  { %1232 = vmatpush3.msra.mxu0 %v1484_v16 }
 0x29c   :  { %1276 = vmatprep.subr.mxu0 %v1325_v0 }
 0x33c   :  { %v342_v36 = vpop.f32.mrf.mxu0 }
 0x33d   :  { %v346_v37 = vmul.f32 %v342_v36, %v198_v23 }
 0x33e   :  { %v1194_v38 = vpop.f32.mrf.mxu0 }
 0x33f   :  { %v352_v39 = vmul.f32 %v350_v35, %v346_v37 }
 0x341   :  { %v358_v41 = vadd.f32 %v356_v40, %v352_v39 }
 0x343   :  { %v360_v42 = vmul.f32 0.044715, %v358_v41  ;;  %v359_v48 = vmul.f32 0.5, %v358_v41 }
 0x345   :  { %v361_v43 = vmul.f32 %v360_v42, %v358_v41  ;;  %v951_v42 = vpack.c.bf16 %v1490_v17, %v1490_v17 }
 0x347   :  { %v362_v44 = vmul.f32 %v361_v43, %v358_v41  ;;  %v1313_v43 = vld [vmem:[%s1716_s5] sm:$0xff]  }
 0x349   :  { %v363_v45 = vadd.f32 %v362_v44, %v358_v41  ;;  %v1312_v41 = vld [vmem:[%s1715_s6] sm:$0xff]   ;;  %v962_v44 = vsel %vm124_vm1, %v951_v42, 0 }
 0x34b   :  { %v364_v46 = vmul.f32 0.7978846, %v363_v45  ;;  %v950_v45 = vld [vmem:[%s1714_s4 + $0xc] sm:$0xf] }
 0x34d   :  { %1317 = vtanh.f32 %v364_v46 }
 0x35a   :  { %v1318_v47 = vpop.eup %1317 }
 0x35b   :  { %v366_v49 = vadd.f32 1.0, %v1318_v47 }
 0x35d   :  { %v367_v50 = vmul.f32 %v366_v49, %v359_v48 }
 0x35f   :  { %v372_v51 = vpack.c.bf16 %v367_v50, %v367_v50 }
 0x361   :  { %1299 = vmatprep.subr.msk.bf16.mxu1 %vm124_vm1, %v372_v51  ;;  %v389_v52 = vsel %vm124_vm1, %v372_v51, 0 }
 0x362   :  { %1196 = vmatpush3.bf16.msra.mxu1 %v389_v52 }
 0x363   :  { %1236 = vmatprep.subr.mxu1 %v1325_v0 }
 0x365   :  { %1198 = vmatmul.mubr.msk.bf16.vlgmr.msra.gmra.mxu1 %vm381_vm3, %v1311_v53 }
 0x366   :  { %1237 = vmatpush3.msk.msra.mxu1 %vm124_vm1, %v1501_v18  ;;  %1238 = vmatprep.mubr.msk.f32.mxu1 %vm1326_vm0, %v1325_v0 }
 0x367   :  { %1241 = vmatprep.subr.mxu1 %v1325_v0 }
 0x425   :  { %v1199_v54 = vpop.f32.mrf.mxu1 }
 0x426   :  { %446 = vrot.lane.b32.xlu0 %v1199_v54, %s1328_s20 }
 0x427   :  { %v425_v55 = vpop.f32.mrf.mxu1 }
 0x428   :  { %439 = vrot.lane.b32.xlu1 %v425_v55, %s1329_s23 }
 0x429   :  { %v1200_v57 = vpop.f32.mrf.mxu1 }
 0x42a   :  { %784 = vperm.xlu0 %1308, %v780_v56  }
 0x42b   :  { %v428_v27 = vpop.f32.mrf.mxu1 }
 0x42c   :  { %457 = vperm.xlu1 %1309, %v371_v58  }
 0x42e   :  { %789 = vperm.xlu0 %1308, %v781_v59  }
 0x430   :  { %758 = vperm.xlu1 %1309, %v461_v60  }
 0x432   :  { %946 = vperm.xlu0 %1308, %v861_v61  }
 0x434   :  { %764 = vperm.xlu1 %1309, %v462_v62  }
 0x498   :  { %v447_v28 = vpop.permute.xlu0 %446 }
 0x499   :  { %v452_v30 = vmul.f32 %v451_v26, %v447_v28 }
 0x49a   :  { %v440_v23 = vpop.permute.xlu1 %439 }
 0x49b   :  { %v445_v25 = vmul.f32 %v444_v22, %v440_v23 }
 0x49d   :  { %v453_v29 = vadd.f32 %v445_v25, %v428_v27 }
 0x49f   :  { %v454_v31 = vadd.f32 %v453_v29, %v452_v30  ;;  %v1314_v30 = vld [vmem:[%s1716_s5 + $0x8] ss:$0 sps:$4 sm:$0xff]  }
 0x4a5   :  { %v785_v48 = vpop.permute.xlu0 %784 }
 0x4a7   :  { %v458_v32 = vpop.permute.xlu1 %457 }
 0x4a8   :  { %v460_v33 = vadd.f32 %v458_v32, %v454_v31 }
 0x4a9   :  { %v790_v56 = vpop.permute.xlu0 %789 }
 0x4aa   :  { %1234 = vmatmul.mubr.f32.vlgmr.msra.gmra.mxu0 %v460_v33 }
 0x4ab   :  { %1277 = vmatpush3.msk.msra.mxu0 %vm124_vm1, %v1501_v18  ;;  %1278 = vmatprep.mubr.msk.f32.mxu0 %vm1326_vm0, %v1325_v0  ;;  %v759_v46 = vpop.permute.xlu1 %758 }
 0x4ac   :  { %1281 = vmatprep.subr.bf16.mxu0 %v1325_v0 }
 0x4af   :  { %v765_v52 = vpop.permute.xlu1 %764 }
 0x56a   :  { %v529_v34 = vpop.f32.mrf.mxu0 }
 0x56b   :  { %v533_v35 = vmul.f32 0.0625, %v529_v34 }
 0x56c   :  { %v1235_v36 = vpop.f32.mrf.mxu0 }
 0x56d   :  { %1239 = vmatmul.mubr.msk.f32.vlgmr.msra.gmra.mxu1 %vm120_vm2, %v533_v35 }
 0x56e   :  { %1242 = vmatpush3.msra.mxu1 %v1376_v1  ;;  %1273 = vmatprep.mubr.msk.f32.mxu1 %vm1326_vm0, %v1325_v0 }
 0x56f   :  { %1243 = vmatprep.subr.mxu1 %v1325_v0 }
 0x570   :  { %1244 = vmatpush3.msra.mxu1 %v1381_v2 }
 0x571   :  { %1245 = vmatprep.subr.mxu1 %v1325_v0 }
 0x572   :  { %1246 = vmatpush3.msra.mxu1 %v1391_v3 }
 0x573   :  { %1247 = vmatprep.subr.mxu1 %v1325_v0 }
 0x574   :  { %1248 = vmatpush3.msra.mxu1 %v1400_v4 }
 0x575   :  { %1249 = vmatprep.subr.mxu1 %v1325_v0 }
 0x576   :  { %1250 = vmatpush3.msra.mxu1 %v1407_v5  ;;  %v46_v5 = vld [vmem:[%s1712_s1] sm:$0xff] }
 0x577   :  { %1251 = vmatprep.subr.mxu1 %v1325_v0 }
 0x578   :  { %1252 = vmatpush3.msra.mxu1 %v1414_v6  ;;  %v771_v6 = vmul.f32 0.044715, %v46_v5 }
 0x579   :  { %1253 = vmatprep.subr.mxu1 %v1325_v0 }
 0x57a   :  { %1254 = vmatpush3.msra.mxu1 %v1421_v7  ;;  %v772_v7 = vmul.f32 %v771_v6, %v46_v5 }
 0x57b   :  { %1255 = vmatprep.subr.mxu1 %v1325_v0 }
 0x57c   :  { %1256 = vmatpush3.msra.mxu1 %v1428_v8  ;;  %v773_v8 = vmul.f32 %v772_v7, %v46_v5  ;;  %v947_v7 = vpop.permute.xlu0 %946 }
 0x57d   :  { %1257 = vmatprep.subr.mxu1 %v1325_v0 }
 0x57e   :  { %1258 = vmatpush3.msra.mxu1 %v1435_v9  ;;  %v774_v9 = vadd.f32 %v773_v8, %v46_v5 }
 0x57f   :  { %1259 = vmatprep.subr.mxu1 %v1325_v0 }
 0x580   :  { %1260 = vmatpush3.msra.mxu1 %v1442_v10  ;;  %v775_v10 = vmul.f32 0.7978846, %v774_v9 }
 0x581   :  { %1261 = vmatprep.subr.mxu1 %v1325_v0 }
 0x582   :  { %1262 = vmatpush3.msra.mxu1 %v1449_v11  ;;  %1319 = vtanh.f32 %v775_v10 }
 0x583   :  { %1263 = vmatprep.subr.mxu1 %v1325_v0 }
 0x584   :  { %1264 = vmatpush3.msra.mxu1 %v1456_v12 }
 0x585   :  { %1265 = vmatprep.subr.mxu1 %v1325_v0 }
 0x586   :  { %1266 = vmatpush3.msra.mxu1 %v1463_v13 }
 0x587   :  { %1267 = vmatprep.subr.mxu1 %v1325_v0 }
 0x588   :  { %1268 = vmatpush3.msra.mxu1 %v1470_v14 }
 0x589   :  { %1269 = vmatprep.subr.mxu1 %v1325_v0 }
 0x58a   :  { %1270 = vmatpush3.msra.mxu1 %v1477_v15 }
 0x58b   :  { %1271 = vmatprep.subr.mxu1 %v1325_v0 }
 0x58c   :  { %1272 = vmatpush3.msra.mxu1 %v1484_v16  ;;  %v770_v16 = vmul.f32 0.5, %v46_v5  ;;  %v939_v5 = vsub.s32 3, %v1619_v19 }
 0x58e   :  { %v940_v9 = vrot.slane %v1625_v21, %v939_v5 }
 0x58f   :  { %v1320_v13 = vpop.eup %1319 }
 0x590   :  { %v777_v18 = vadd.f32 1.0, %v1320_v13 }
 0x592   :  { %v778_v37 = vmul.f32 %v777_v18, %v770_v16 }
 0x594   :  { %v779_v38 = vpack.c.bf16 %v778_v37, %v778_v37 }
 0x596   :  { %v803_v39 = vsel %vm801_vm4, %v779_v38, 0 }
 0x62d   :  { %v603_v1 = vpop.f32.mrf.mxu1 }
 0x62e   :  { %v607_v2 = vsub.f32 %v460_v33, %v603_v1 }
 0x62f   :  { %v1240_v3 = vpop.f32.mrf.mxu1 }
 0x630   :  { %v608_v4 = vmul.f32 %v607_v2, %v607_v2  ;;  %v932_v3 = vsub.s32 2, %v1619_v19 }
 0x632   :  { %1274 = vmatmul.mubr.f32.vlgmr.msra.gmra.mxu1 %v608_v4  ;;  %v933_v4 = vrot.slane %v1625_v21, %v932_v3 }
 0x633   :  { %1289 = vmatprep.mubr.msk.bf16.mxu1 %vm797_vm5, %v1313_v43 }
 0x6f2   :  { %v675_v11 = vpop.f32.mrf.mxu1 }
 0x6f3   :  { %v679_v12 = vmul.f32 0.0625, %v675_v11 }
 0x6f4   :  { %v1275_v14 = vpop.f32.mrf.mxu1 }
 0x6f5   :  { %v680_v15 = vadd.f32 1e-05, %v679_v12 }
 0x6f7   :  { %1321 = vrsqrt.f32 %v680_v15 }
 0x704   :  { %v1322_v40 = vpop.eup %1321 }
 0x705   :  { %1279 = vmatmul.mubr.msk.f32.vlgmr.msra.gmra.mxu0 %vm120_vm2, %v1322_v40 }
 0x706   :  { %1282 = vmatpush3.bf16.msra.mxu0 %v803_v39  ;;  %1283 = vmatprep.mubr.msk.bf16.mxu0 %vm1326_vm0, %v1325_v0 }
 0x707   :  { %1293 = vmatprep.subr.bf16.mxu0 %v1325_v0 }
 0x709   :  { %1284 = vmatmul.mubr.msk.bf16.vlgmr.msra.gmra.mxu0 %vm797_vm5, %v1312_v41 }
 0x70a   :  { %1295 = vmatprep.mubr.msk.bf16.mxu0 %vm1326_vm0, %v1325_v0  ;;  %1294 = vmatpush3.bf16.msra.mxu0 %v962_v44 }
 0x711   :  { %1296 = vmatmul.mubr.msk.bf16.vlgmr.msra.gmra.mxu0 %vm381_vm3, %v950_v45 }
 0x7c5   :  { %v751_v0 = vpop.f32.mrf.mxu0 }
 0x7c6   :  { %v755_v47 = vmul.f32 %v751_v0, %v607_v2  ;;  %v952_v2 = vld [vmem:[%s1713_s3 + $0x40] sm:$0xff] }
 0x7c7   :  { %v1280_v17 = vpop.f32.mrf.mxu0 }
 0x7c8   :  { %v761_v49 = vmul.f32 %v759_v46, %v755_v47 }
 0x7c9   :  { %v839_v50 = vpop.f32.mrf.mxu0 }
 0x7ca   :  { %v840_v51 = vadd.f32 %v839_v50, %v785_v48  ;;  %v767_v54 = vadd.f32 %v765_v52, %v761_v49 }
 0x7cb   :  { %v1285_v53 = vpop.f32.mrf.mxu0 }
 0x7cc   :  { %v846_v55 = vadd.f32 1.0, %v840_v51 }
 0x7cd   :  { %v842_v57 = vpop.f32.mrf.mxu0 }
 0x7ce   :  { %v847_v58 = vmul.f32 %v846_v55, %v767_v54  ;;  %v843_v59 = vadd.f32 %v842_v57, %v790_v56 }
 0x7cf   :  { %v1286_v60 = vpop.f32.mrf.mxu0 }
 0x7d0   :  { %v848_v61 = vadd.f32 %v847_v58, %v843_v59 }
 0x7d1   :  { %v998_v31 = vpop.f32.mrf.mxu0 }
 0x7d2   :  { %v850_v62 = vmul.f32 0.044715, %v848_v61  ;;  %v849_v25 = vmul.f32 0.5, %v848_v61 }
 0x7d3   :  { %v1297_v32 = vpop.f32.mrf.mxu0 }
 0x7d4   :  { %v851_v63 = vmul.f32 %v850_v62, %v848_v61 }
 0x7d5   :  { %v1001_v33 = vpop.f32.mrf.mxu0 }
 0x7d6   :  { %v852_v20 = vmul.f32 %v851_v63, %v848_v61 }
 0x7d7   :  { %v1298_v35 = vpop.f32.mrf.mxu0 }
 0x7d8   :  { %v853_v22 = vadd.f32 %v852_v20, %v848_v61 }
 0x7da   :  { %v854_v23 = vmul.f32 0.7978846, %v853_v22 }
 0x7dc   :  { %1323 = vtanh.f32 %v854_v23 }
 0x7e9   :  { %v1324_v24 = vpop.eup %1323 }
 0x7ea   :  { %v856_v26 = vadd.f32 1.0, %v1324_v24 }
 0x7ec   :  { %v857_v27 = vmul.f32 %v856_v26, %v849_v25 }
 0x7ee   :  { %v862_v28 = vpack.c.bf16 %v857_v27, %v857_v27 }
 0x7f0   :  { %1300 = vmatprep.subr.msk.bf16.mxu1 %vm801_vm4, %v862_v28  ;;  %v878_v29 = vsel %vm801_vm4, %v862_v28, 0 }
 0x7f1   :  { %1288 = vmatpush3.bf16.msra.mxu1 %v878_v29 }
 0x7f4   :  { %1290 = vmatmul.mubr.msk.bf16.vlgmr.msra.gmra.mxu1 %vm797_vm5, %v1314_v30 }
 0x8b4   :  { %v1291_v34 = vpop.f32.mrf.mxu1 }
 0x8b5   :  { %935 = vrot.lane.b32.xlu0 %v1291_v34, %s1330_s18 }
 0x8b6   :  { %v914_v36 = vpop.f32.mrf.mxu1 }
 0x8b7   :  { %928 = vrot.lane.b32.xlu1 %v914_v36, %s1331_s19 }
 0x8b8   :  { %v1292_v1 = vpop.f32.mrf.mxu1 }
 0x8ba   :  { %v917_v10 = vpop.f32.mrf.mxu1 }
 0x8bb   :  { %955 = vperm.xlu1 %1309, %v952_v2  }
 0x927   :  { %v936_v11 = vpop.permute.xlu0 %935 }
 0x928   :  { %v941_v13 = vmul.f32 %v940_v9, %v936_v11 }
 0x929   :  { %v929_v6 = vpop.permute.xlu1 %928 }
 0x92a   :  { %v934_v8 = vmul.f32 %v933_v4, %v929_v6 }
 0x92c   :  { %v942_v12 = vadd.f32 %v934_v8, %v917_v10 }
 0x92e   :  { %v943_v14 = vadd.f32 %v942_v12, %v941_v13 }
 0x930   :  { %v949_v16 = vadd.f32 %v947_v7, %v943_v14 }
 0x936   :  { %v956_v15 = vpop.permute.xlu1 %955 }
 0x937   :  { %v999_v18 = vadd.f32 %v998_v31, %v956_v15 }
 0x939   :  { %v1004_v37 = vadd.f32 %v999_v18, %v949_v16 }
 0x93b   :  { %1005 = vst [vmem:[%s1717_s7] sm:$0xff] %v1004_v37 }

</bundles_post_ra>
